<compile_context>
chip_gen: v5e
topology: v5e:2x2
jax: 0.10.0
libtpu: 0.0.40
codegen_flags: <defaults>
</compile_context>

<pallas_src>
import functools
import math

import jax
import jax.numpy as jnp
from jax.experimental import pallas as pl
from jax.experimental.pallas import tpu as pltpu


_LANE = 128     # vreg lane width (last dim)
_SUBLANE = 8    # f32 sublane width (second-to-last dim)


def _round_up(x, m):
    return ((x + m - 1) // m) * m


def _cdiv(a, b):
    return (a + b - 1) // b


# ---------------------------------------------------------------------------
# Activations
# ---------------------------------------------------------------------------
def _kernel_activation(h, activation, slope):
    """f32 elementwise activation used inside the Pallas kernel."""
    if activation == "ReLU":
        return jnp.maximum(h, 0.0)
    if activation == "LeakyReLU":
        return jnp.where(h >= 0, h, slope * h)
    if activation == "GELU":
        # torch.nn.GELU default: exact (erf) formulation
        return 0.5 * h * (1.0 + jax.lax.erf(h * (1.0 / math.sqrt(2.0))))
    if activation == "SELU":
        alpha = 1.6732632423543772
        scale = 1.0507009873554805
        # clamp exp arg: positive branch never uses it; avoids transient inf
        e = jnp.exp(jnp.minimum(h, 0.0))
        return scale * jnp.where(h > 0, h, alpha * (e - 1.0))
    if activation == "SiLU":
        # exp + approximate reciprocal both live on the EUP slot -> VALU stays free
        denom = 1.0 + jnp.exp(jnp.minimum(-h, 60.0))
        return h * pl.reciprocal(denom, approx=True)
    if activation == "CELU":
        inv_slope = 1.0 / slope
        e = jnp.exp(jnp.minimum(h * inv_slope, 0.0))
        return jnp.where(h > 0, h, slope * (e - 1.0))
    raise ValueError(f"{activation} not an available activation")


def _ref_activation(h, activation, slope):
    """Pure-jnp reference activation (exact divide, no Pallas primitives)."""
    if activation == "ReLU":
        return jnp.maximum(h, 0.0)
    if activation == "LeakyReLU":
        return jnp.where(h >= 0, h, slope * h)
    if activation == "GELU":
        return 0.5 * h * (1.0 + jax.lax.erf(h / jnp.sqrt(2.0)))
    if activation == "SELU":
        alpha = 1.6732632423543772
        scale = 1.0507009873554805
        return scale * jnp.where(h > 0, h,
                                 alpha * (jnp.exp(jnp.minimum(h, 0.0)) - 1.0))
    if activation == "SiLU":
        return h / (1.0 + jnp.exp(-h))
    if activation == "CELU":
        return jnp.where(h > 0, h,
                         slope * (jnp.exp(jnp.minimum(h / slope, 0.0)) - 1.0))
    raise ValueError(f"{activation} not an available activation")


# ---------------------------------------------------------------------------
# Pallas kernel: full MLP hot path (all matmuls + activations) in VMEM.
# ---------------------------------------------------------------------------
def _znet_kernel(*refs, num_hidden, activation, slope, mxu_dtype):
    # refs layout: x_ref, (w_ref, b_ref) * num_hidden, w_last_ref, o_ref
    x_ref = refs[0]
    w_last_ref = refs[-2]
    o_ref = refs[-1]

    h = x_ref[...].astype(jnp.float32)
    # NOTE: for very deep nets, stack the (units,units) hidden weights and drive
    # this with lax.fori_loop to bound vreg live ranges; unrolled is fine here.
    for l in range(num_hidden):
        w_ref = refs[1 + 2 * l]
        b_ref = refs[2 + 2 * l]
        acc = jnp.dot(h.astype(mxu_dtype), w_ref[...],
                      preferred_element_type=jnp.float32)
        bias = jnp.broadcast_to(b_ref[...].astype(jnp.float32), acc.shape)
        h = _kernel_activation(acc + bias, activation, slope)
    out = jnp.dot(h.astype(mxu_dtype), w_last_ref[...],
                  preferred_element_type=jnp.float32)
    o_ref[...] = out.astype(o_ref.dtype)


# ---------------------------------------------------------------------------
# Wrapper: padding, tiling, BlockSpecs, pallas_call
# ---------------------------------------------------------------------------
def _choose_batch_tile(batch):
    b8 = _round_up(batch, _SUBLANE)
    if b8 <= _SUBLANE:
        return b8
    # Tiles of <=512 rows and >=2 grid steps so the HBM<->VMEM pipeline has
    # something to overlap and v7x megacore can split the batch axis.
    n_tiles = max(2, _cdiv(b8, 512))
    return _round_up(_cdiv(b8, n_tiles), _SUBLANE)


def znet_forward(x, weights, biases, w_last, *, activation="ReLU", slope=0.01,
                 batch_tile=None, mxu_dtype=jnp.float32):
    """Z_Net forward via a single pallas_call.

    x       : (B, dim)           float32
    weights : list of (in, out)  float32  (hidden layers, pre-transposed)
    biases  : list of (1, out)   float32
    w_last  : (units, dim)       float32  (final layer, no bias)
    mxu_dtype: dtype fed to the MXU (f32 or bf16); accumulation is always f32.
    """
    B, dim = x.shape
    num_hidden = len(weights)
    units = weights[0].shape[1]
    f32 = jnp.float32

    # ---- lane/sublane padding (done in the wrapper; sliced off at the end) --
    dim_p = _round_up(dim, _LANE)
    units_p = _round_up(units, _LANE)
    if batch_tile is None:
        batch_tile = _choose_batch_tile(B)
    batch_tile = _round_up(batch_tile, _SUBLANE)
    B_p = _round_up(B, batch_tile)
    grid = (B_p // batch_tile,)

    x_p = jnp.pad(x.astype(f32), ((0, B_p - B), (0, dim_p - dim)))

    args = [x_p]
    in_specs = [pl.BlockSpec((batch_tile, dim_p), lambda i: (i, 0))]

    prev_p = dim_p
    for w, b in zip(weights, biases):
        fin, fout = w.shape
        w_p = jnp.pad(w.astype(f32),
                      ((0, prev_p - fin), (0, units_p - fout))).astype(mxu_dtype)
        b_p = jnp.pad(b.astype(f32).reshape(1, -1), ((0, 0), (0, units_p - fout)))
        args += [w_p, b_p]
        # Grid-invariant: keep a single copy resident in VMEM (no double buffer)
        in_specs += [pl.BlockSpec(memory_space=pltpu.MemorySpace.VMEM),
                     pl.BlockSpec(memory_space=pltpu.MemorySpace.VMEM)]
        prev_p = units_p

    wl_p = jnp.pad(w_last.astype(f32),
                   ((0, units_p - w_last.shape[0]),
                    (0, dim_p - w_last.shape[1]))).astype(mxu_dtype)
    args.append(wl_p)
    in_specs.append(pl.BlockSpec(memory_space=pltpu.MemorySpace.VMEM))

    # Lane-dense output tile (last dim a multiple of 128)
    out_specs = pl.BlockSpec((batch_tile, dim_p), lambda i: (i, 0))

    # ---- advisory cost estimate & explicit VMEM budget ----------------------
    w_items = jnp.dtype(mxu_dtype).itemsize
    weight_bytes = (dim_p * units_p + (num_hidden - 1) * units_p * units_p
                    + units_p * dim_p) * w_items + num_hidden * units_p * 4
    flops = 2 * B_p * (dim_p * units_p + (num_hidden - 1) * units_p * units_p
                       + units_p * dim_p)
    transcendentals = (0 if activation in ("ReLU", "LeakyReLU")
                       else B_p * units_p * num_hidden)
    cost = pl.CostEstimate(flops=flops, transcendentals=transcendentals,
                           bytes_accessed=weight_bytes + 2 * B_p * dim_p * 4)

    tile_io_bytes = 2 * 2 * batch_tile * dim_p * 4          # x/out, double-buffered
    work_bytes = 6 * batch_tile * max(units_p, dim_p) * 4   # live activations headroom
    vmem_limit = int(min(48 * 2**20,
                         max(32 * 2**20,
                             2 * (weight_bytes + tile_io_bytes + work_bytes))))

    kernel = functools.partial(
        _znet_kernel, num_hidden=num_hidden, activation=activation,
        slope=slope, mxu_dtype=mxu_dtype)

    out_p = pl.pallas_call(
        kernel,
        out_shape=jax.ShapeDtypeStruct((B_p, dim_p), f32),
        grid=grid,
        in_specs=in_specs,
        out_specs=out_specs,
        compiler_params=pltpu.CompilerParams(
            dimension_semantics=("parallel",),
            vmem_limit_bytes=vmem_limit),
        cost_estimate=cost,
    )(*args)

    return out_p[:B, :dim].astype(x.dtype)


# ---------------------------------------------------------------------------
# Deterministic parameter init (mirrors nn.Linear + kaiming_uniform_ shapes)
# ---------------------------------------------------------------------------
def init_znet_params(key, dim, units, num_layers):
    """Returns (weights, biases, w_last).  Weights are (in, out)."""
    sizes = [(dim, units)] + [(units, units)] * (num_layers - 1)
    weights, biases = [], []
    for fan_in, fan_out in sizes:
        key, kw, kb = jax.random.split(key, 3)
        bound_w = math.sqrt(6.0 / fan_in)          # kaiming_uniform_, a=0
        w = jax.random.uniform(kw, (fan_in, fan_out), jnp.float32,
                               minval=-bound_w, maxval=bound_w)
        bound_b = 1.0 / math.sqrt(fan_in)          # nn.Linear default bias init
        b = jax.random.uniform(kb, (1, fan_out), jnp.float32,
                               minval=-bound_b, maxval=bound_b)
        weights.append(w)
        biases.append(b)
    key, kl = jax.random.split(key)
    bound_l = math.sqrt(6.0 / units)
    w_last = jax.random.uniform(kl, (units, dim), jnp.float32,
                                minval=-bound_l, maxval=bound_l)
    return weights, biases, w_last


# ---------------------------------------------------------------------------
# Pure-JAX reference for correctness check
# ---------------------------------------------------------------------------
def znet_ref(x, weights, biases, w_last, activation="ReLU", slope=0.01):
    h = x
    for w, b in zip(weights, biases):
        h = _ref_activation(h @ w + b, activation, slope)
    return h @ w_last


if __name__ == "__main__":
    # Small shapes consistent with Z_Net(dim, units, num_layers, ...)
    dim, units, num_layers = 4, 32, 2
    batch = 8
    slope = 0.01

    key = jax.random.PRNGKey(0)
    key, kx = jax.random.split(key)
    x = jax.random.normal(kx, (batch, dim), jnp.float32)
    weights, biases, w_last = init_znet_params(key, dim, units, num_layers)

    # 1) f32 MXU path, ReLU (tight check)
    out = znet_forward(x, weights, biases, w_last, activation="ReLU", slope=slope)
    out = jax.block_until_ready(out)
    ref = znet_ref(x, weights, biases, w_last, "ReLU", slope)
    assert out.shape == (batch, dim)
    assert jnp.allclose(out, ref, atol=1e-5, rtol=1e-5), "f32 ReLU mismatch"

    # 2) bf16 MXU-input / f32-accumulate path, ReLU (looser tolerance)
    out_bf16 = jax.block_until_ready(
        znet_forward(x, weights, biases, w_last, activation="ReLU", slope=slope,
                     mxu_dtype=jnp.bfloat16))
    assert jnp.allclose(out_bf16, ref, atol=5e-2, rtol=5e-2), "bf16 ReLU mismatch"

    # 3) SiLU path (exercises EUP exp + approximate reciprocal)
    out_silu = jax.block_until_ready(
        znet_forward(x, weights, biases, w_last, activation="SiLU", slope=slope))
    ref_silu = znet_ref(x, weights, biases, w_last, "SiLU", slope)
    assert jnp.allclose(out_silu, ref_silu, atol=5e-2, rtol=5e-2), "SiLU mismatch"

    print("KERNEL_OK")
</pallas_src>

<mosaic_0001>
module attributes {stable_mosaic.version = 11 : i64} {
  func.func @_znet_kernel(%arg0: i32, %arg1: memref<8x128xf32, #tpu.memory_space<vmem>>, %arg2: memref<128x128xf32, #tpu.memory_space<vmem>>, %arg3: memref<1x128xf32, #tpu.memory_space<vmem>>, %arg4: memref<128x128xf32, #tpu.memory_space<vmem>>, %arg5: memref<1x128xf32, #tpu.memory_space<vmem>>, %arg6: memref<128x128xf32, #tpu.memory_space<vmem>>, %arg7: memref<8x128xf32, #tpu.memory_space<vmem>>) attributes {dimension_semantics = [#tpu.dimension_semantics<parallel>], iteration_bounds = array<i64: 1>, scalar_prefetch = 0 : i64, scratch_operands = 0 : i64, tpu.core_type = #tpu.core_type<tc>, window_params = [{transform_indices = @transform_0, window_bounds = array<i64: 8, 128>}, {pipeline_mode = #tpu.pipeline_mode<synchronous>, transform_indices = @transform_1, window_bounds = array<i64: 128, 128>}, {pipeline_mode = #tpu.pipeline_mode<synchronous>, transform_indices = @transform_2, window_bounds = array<i64: 1, 128>}, {pipeline_mode = #tpu.pipeline_mode<synchronous>, transform_indices = @transform_3, window_bounds = array<i64: 128, 128>}, {pipeline_mode = #tpu.pipeline_mode<synchronous>, transform_indices = @transform_4, window_bounds = array<i64: 1, 128>}, {pipeline_mode = #tpu.pipeline_mode<synchronous>, transform_indices = @transform_5, window_bounds = array<i64: 128, 128>}, {transform_indices = @transform_6, window_bounds = array<i64: 8, 128>}]} {
    %c0 = arith.constant 0 : index
    %c0_0 = arith.constant 0 : index
    %0 = vector.load %arg1[%c0, %c0_0] : memref<8x128xf32, #tpu.memory_space<vmem>>, vector<8x128xf32>
    %c0_1 = arith.constant 0 : index
    %c0_2 = arith.constant 0 : index
    %1 = vector.load %arg2[%c0_1, %c0_2] : memref<128x128xf32, #tpu.memory_space<vmem>>, vector<128x128xf32>
    %cst = arith.constant dense<0.000000e+00> : vector<8x128xf32>
    %2 = tpu.matmul %0, %1, %cst {dimension_numbers = #tpu.dot_dimension_numbers<[1], [0], [0], [1], [0, 0, 1, 1], [], []>} : vector<8x128xf32>, vector<128x128xf32>, vector<8x128xf32> -> vector<8x128xf32>
    %c0_3 = arith.constant 0 : index
    %c0_4 = arith.constant 0 : index
    %3 = vector.load %arg3[%c0_3, %c0_4] : memref<1x128xf32, #tpu.memory_space<vmem>>, vector<1x128xf32>
    %4 = vector.shape_cast %3 : vector<1x128xf32> to vector<1x128xf32>
    %5 = vector.broadcast %4 : vector<1x128xf32> to vector<8x128xf32>
    %6 = arith.addf %2, %5 : vector<8x128xf32>
    %cst_5 = arith.constant 0.000000e+00 : f32
    %7 = vector.broadcast %cst_5 : f32 to vector<8x128xf32>
    %8 = arith.maximumf %6, %7 : vector<8x128xf32>
    %c0_6 = arith.constant 0 : index
    %c0_7 = arith.constant 0 : index
    %9 = vector.load %arg4[%c0_6, %c0_7] : memref<128x128xf32, #tpu.memory_space<vmem>>, vector<128x128xf32>
    %cst_8 = arith.constant dense<0.000000e+00> : vector<8x128xf32>
    %10 = tpu.matmul %8, %9, %cst_8 {dimension_numbers = #tpu.dot_dimension_numbers<[1], [0], [0], [1], [0, 0, 1, 1], [], []>} : vector<8x128xf32>, vector<128x128xf32>, vector<8x128xf32> -> vector<8x128xf32>
    %c0_9 = arith.constant 0 : index
    %c0_10 = arith.constant 0 : index
    %11 = vector.load %arg5[%c0_9, %c0_10] : memref<1x128xf32, #tpu.memory_space<vmem>>, vector<1x128xf32>
    %12 = vector.shape_cast %11 : vector<1x128xf32> to vector<1x128xf32>
    %13 = vector.broadcast %12 : vector<1x128xf32> to vector<8x128xf32>
    %14 = arith.addf %10, %13 : vector<8x128xf32>
    %cst_11 = arith.constant 0.000000e+00 : f32
    %15 = vector.broadcast %cst_11 : f32 to vector<8x128xf32>
    %16 = arith.maximumf %14, %15 : vector<8x128xf32>
    %c0_12 = arith.constant 0 : index
    %c0_13 = arith.constant 0 : index
    %17 = vector.load %arg6[%c0_12, %c0_13] : memref<128x128xf32, #tpu.memory_space<vmem>>, vector<128x128xf32>
    %cst_14 = arith.constant dense<0.000000e+00> : vector<8x128xf32>
    %18 = tpu.matmul %16, %17, %cst_14 {dimension_numbers = #tpu.dot_dimension_numbers<[1], [0], [0], [1], [0, 0, 1, 1], [], []>} : vector<8x128xf32>, vector<128x128xf32>, vector<8x128xf32> -> vector<8x128xf32>
    %c0_15 = arith.constant 0 : index
    %c0_16 = arith.constant 0 : index
    %19 = vector.load %arg7[%c0_15, %c0_16] : memref<8x128xf32, #tpu.memory_space<vmem>>, vector<8x128xf32>
    tpu.vector_store %arg7[%c0_15, %c0_16], %18 {strides = array<i32>} : memref<8x128xf32, #tpu.memory_space<vmem>>, vector<8x128xf32>,
    return
  }
  func.func @transform_0(%arg0: i32) -> (i32, i32) {
    %c0_i32 = arith.constant 0 : i32
    %c0_i32_0 = arith.constant 0 : i32
    return %arg0, %c0_i32 : i32, i32
  }
  func.func @transform_1(%arg0: i32) -> (i32, i32) {
    %c0_i32 = arith.constant 0 : i32
    %c0_i32_0 = arith.constant 0 : i32
    %c0_i32_1 = arith.constant 0 : i32
    return %c0_i32, %c0_i32_0 : i32, i32
  }
  func.func @transform_2(%arg0: i32) -> (i32, i32) {
    %c0_i32 = arith.constant 0 : i32
    %c0_i32_0 = arith.constant 0 : i32
    %c0_i32_1 = arith.constant 0 : i32
    return %c0_i32, %c0_i32_0 : i32, i32
  }
  func.func @transform_3(%arg0: i32) -> (i32, i32) {
    %c0_i32 = arith.constant 0 : i32
    %c0_i32_0 = arith.constant 0 : i32
    %c0_i32_1 = arith.constant 0 : i32
    return %c0_i32, %c0_i32_0 : i32, i32
  }
  func.func @transform_4(%arg0: i32) -> (i32, i32) {
    %c0_i32 = arith.constant 0 : i32
    %c0_i32_0 = arith.constant 0 : i32
    %c0_i32_1 = arith.constant 0 : i32
    return %c0_i32, %c0_i32_0 : i32, i32
  }
  func.func @transform_5(%arg0: i32) -> (i32, i32) {
    %c0_i32 = arith.constant 0 : i32
    %c0_i32_0 = arith.constant 0 : i32
    %c0_i32_1 = arith.constant 0 : i32
    return %c0_i32, %c0_i32_0 : i32, i32
  }
  func.func @transform_6(%arg0: i32) -> (i32, i32) {
    %c0_i32 = arith.constant 0 : i32
    %c0_i32_0 = arith.constant 0 : i32
    return %arg0, %c0_i32 : i32, i32
  }
}

</mosaic_0001>

<bundles_post_ra>
// kernel: tpu_custom_call.1
= control target key start
LH: loop header
LB: loop body
LE: loop exit
PB: predicated region body
PF: predicated region fallthrough
CT: control target
= control target key end

     0   :  { %11 = vsyncpa [#allocation3], 0  ;;  %s424_s0 = inlined_call_operand.hbm [shape: f32[8,128], index: 0, kind: input, shape index: {}]   ;;  %s425_s1 = inlined_call_operand.hbm [shape: f32[128,128], index: 1, kind: input, shape index: {}]   ;;  %s426_s2 = inlined_call_operand.vmem [shape: f32[1,128], index: 2, kind: input, shape index: {}]   ;;  %s427_s3 = inlined_call_operand.hbm [shape: f32[128,128], index: 3, kind: input, shape index: {}]   ;;  %s428_s4 = inlined_call_operand.vmem [shape: f32[1,128], index: 4, kind: input, shape index: {}]   ;;  %s429_s5 = inlined_call_operand.hbm [shape: f32[128,128], index: 5, kind: input, shape index: {}]   ;;  %s430_s6 = inlined_call_operand.hbm [shape: f32[8,128], index: 6, kind: output, shape index: {}]  }
   0x1   :  { %12 = vsyncpa [#allocation6], 0 }
   0x2   :  { %13 = vsyncpa [#allocation9], 0  ;;  %s30_s23 = sshll.u32 %s425_s1, 4  ;;  %s31_s23 = int_to_ptr.hbm [resolvable:$true] %s30_s23 }
   0x3   :  { %14 = vsyncpa [#allocation4], 0  ;;  %s361_s24 = smov [#allocation5]   ;;  %s20_s28 = sshll.u32 %s424_s0, 4  ;;  %s21_s28 = int_to_ptr.hbm [resolvable:$true] %s20_s28 }
   0x4   :  { %s32_s25 = sshll.u32 %s361_s24, 4  ;;  %s362_s29 = smov 128   ;;  %s33_s25 = int_to_ptr.vmem [resolvable:$true] %s32_s25 }
   0x5   :  { %s363_s30 = smov 8   ;;  %s364_s7 = smov [#allocation2]  }
   0x6   :  { %38 = dma.hbm_to_vmem [thread:$0]  %s31_s23, 2048, %s33_s25, [#allocation6], %s362_s29, %s362_s29, %s363_s30  }
   0x7   :  { %s22_s8 = sshll.u32 %s364_s7, 4  ;;  %s45_s11 = sshll.u32 %s427_s3, 4  ;;  %s23_s8 = int_to_ptr.vmem [resolvable:$true] %s22_s8  ;;  %s46_s11 = int_to_ptr.hbm [resolvable:$true] %s45_s11 }
   0x8   :  { %25 = dma.hbm_to_vmem [thread:$0]  %s21_s28, 128, %s23_s8, [#allocation3]  }
   0x9   :  { %s60_s13 = sshll.u32 %s429_s5, 4  ;;  %s365_s14 = smov [#allocation7]   ;;  %s61_s13 = int_to_ptr.hbm [resolvable:$true] %s60_s13 }
   0xa   :  { %s47_s15 = sshll.u32 %s365_s14, 4  ;;  %s366_s0 = smov [#allocation8]   ;;  %s48_s15 = int_to_ptr.vmem [resolvable:$true] %s47_s15 }
   0xb   :  { %53 = dma.hbm_to_vmem [thread:$0]  %s46_s11, 2048, %s48_s15, [#allocation6], %s362_s29, %s362_s29, %s363_s30  }
   0xc   :  { %s62_s16 = sshll.u32 %s366_s0, 4  ;;  %s63_s16 = int_to_ptr.vmem [resolvable:$true] %s62_s16 }
   0xd   :  { %68 = dma.hbm_to_vmem [thread:$0]  %s61_s13, 2048, %s63_s16, [#allocation9], %s362_s29, %s362_s29, %s363_s30  }
   0xe   :  { %353 = dma.done.wait [#allocation3], 128  }
   0xf   :  { %354 = vsyncadd [#allocation3], 4294967168 }
  0x10   :  { %355 = dma.done.wait [#allocation6], 4096  }
  0x11   :  { %356 = vsyncadd [#allocation6], 4294963200 }
  0x12   :  { %357 = dma.done.wait [#allocation9], 2048  }
  0x13   :  { %358 = vsyncadd [#allocation9], 4294965248  ;;  %v101_v0 = vld [vmem:[#allocation5 + $0x78] sm:$0xff]  ;;  %v100_v1 = vld [vmem:[#allocation5 + $0x70] sm:$0xff]  ;;  %s212_s22 = sshll.u32 %s430_s6, 4  ;;  %s213_s22 = int_to_ptr.hbm [resolvable:$true] %s212_s22 }
  0x14   :  { %106 = vmatpush.msra.mxu0 %v101_v0  ;;  %v99_v2 = vld [vmem:[#allocation5 + $0x68] sm:$0xff]  ;;  %v98_v3 = vld [vmem:[#allocation5 + $0x60] sm:$0xff]  ;;  %v142_v4 = vld [vmem:[#allocation7 + $0x78] sm:$0xff] }
  0x15   :  { %v97_v5 = vld [vmem:[#allocation5 + $0x58] sm:$0xff]  ;;  %147 = vmatpush.msra.mxu1 %v142_v4  ;;  %v141_v6 = vld [vmem:[#allocation7 + $0x70] sm:$0xff]  ;;  %v140_v7 = vld [vmem:[#allocation7 + $0x68] sm:$0xff] }
  0x16   :  { %107 = vmatpush.msra.mxu0 %v100_v1  ;;  %v96_v8 = vld [vmem:[#allocation5 + $0x50] sm:$0xff]  ;;  %v139_v9 = vld [vmem:[#allocation7 + $0x60] sm:$0xff]  ;;  %v95_v10 = vld [vmem:[#allocation5 + $0x48] sm:$0xff] }
  0x17   :  { %148 = vmatpush.msra.mxu1 %v141_v6  ;;  %v138_v11 = vld [vmem:[#allocation7 + $0x58] sm:$0xff]  ;;  %v94_v12 = vld [vmem:[#allocation5 + $0x40] sm:$0xff]  ;;  %v137_v13 = vld [vmem:[#allocation7 + $0x50] sm:$0xff] }
  0x18   :  { %108 = vmatpush.msra.mxu0 %v99_v2  ;;  %v93_v14 = vld [vmem:[#allocation5 + $0x38] sm:$0xff]  ;;  %v136_v15 = vld [vmem:[#allocation7 + $0x48] sm:$0xff]  ;;  %v92_v16 = vld [vmem:[#allocation5 + $0x30] sm:$0xff] }
  0x19   :  { %149 = vmatpush.msra.mxu1 %v140_v7  ;;  %v135_v17 = vld [vmem:[#allocation7 + $0x40] sm:$0xff]  ;;  %v91_v18 = vld [vmem:[#allocation5 + $0x28] sm:$0xff]  ;;  %v134_v19 = vld [vmem:[#allocation7 + $0x38] sm:$0xff] }
  0x1a   :  { %109 = vmatpush.msra.mxu0 %v98_v3  ;;  %v90_v20 = vld [vmem:[#allocation5 + $0x20] sm:$0xff]  ;;  %v133_v21 = vld [vmem:[#allocation7 + $0x30] sm:$0xff]  ;;  %v89_v22 = vld [vmem:[#allocation5 + $0x18] sm:$0xff] }
  0x1b   :  { %150 = vmatpush.msra.mxu1 %v139_v9  ;;  %v132_v23 = vld [vmem:[#allocation7 + $0x28] sm:$0xff]  ;;  %v88_v24 = vld [vmem:[#allocation5 + $0x10] sm:$0xff]  ;;  %v131_v25 = vld [vmem:[#allocation7 + $0x20] sm:$0xff] }
  0x1c   :  { %110 = vmatpush.msra.mxu0 %v97_v5  ;;  %v87_v26 = vld [vmem:[#allocation5 + $0x8] sm:$0xff]  ;;  %v130_v27 = vld [vmem:[#allocation7 + $0x18] sm:$0xff]  ;;  %v86_v28 = vld [vmem:[#allocation5] sm:$0xff] }
  0x1d   :  { %151 = vmatpush.msra.mxu1 %v138_v11  ;;  %v85_v29 = vld [vmem:[#allocation2] sm:$0xff]  ;;  %v129_v30 = vld [vmem:[#allocation7 + $0x10] sm:$0xff]  ;;  %v128_v31 = vld [vmem:[#allocation7 + $0x8] sm:$0xff] }
  0x1e   :  { %111 = vmatpush.msra.mxu0 %v96_v8  ;;  %v127_v32 = vld [vmem:[#allocation7] sm:$0xff]  ;;  %v183_v33 = vld [vmem:[#allocation8 + $0x78] sm:$0xff]  ;;  %v182_v34 = vld [vmem:[#allocation8 + $0x70] sm:$0xff] }
  0x1f   :  { %152 = vmatpush.msra.mxu1 %v137_v13  ;;  %184 = vmatpush.msra.mxu2 %v183_v33  ;;  %v181_v35 = vld [vmem:[#allocation8 + $0x68] sm:$0xff]  ;;  %v180_v36 = vld [vmem:[#allocation8 + $0x60] sm:$0xff]  ;;  %v179_v37 = vld [vmem:[#allocation8 + $0x58] sm:$0xff] }
  0x20   :  { %112 = vmatpush.msra.mxu0 %v95_v10  ;;  %v178_v38 = vld [vmem:[#allocation8 + $0x50] sm:$0xff]  ;;  %v177_v39 = vld [vmem:[#allocation8 + $0x48] sm:$0xff]  ;;  %v176_v40 = vld [vmem:[#allocation8 + $0x40] sm:$0xff] }
  0x21   :  { %153 = vmatpush.msra.mxu1 %v136_v15  ;;  %185 = vmatpush.msra.mxu2 %v182_v34  ;;  %v175_v41 = vld [vmem:[#allocation8 + $0x38] sm:$0xff]  ;;  %v174_v42 = vld [vmem:[#allocation8 + $0x30] sm:$0xff]  ;;  %v173_v43 = vld [vmem:[#allocation8 + $0x28] sm:$0xff] }
  0x22   :  { %113 = vmatpush.msra.mxu0 %v94_v12  ;;  %v172_v44 = vld [vmem:[#allocation8 + $0x20] sm:$0xff]  ;;  %v171_v45 = vld [vmem:[#allocation8 + $0x18] sm:$0xff]  ;;  %v170_v50 = vld [vmem:[#allocation8 + $0x10] sm:$0xff] }
  0x23   :  { %154 = vmatpush.msra.mxu1 %v135_v17  ;;  %186 = vmatpush.msra.mxu2 %v181_v35  ;;  %v231_v46 = vld [vmem:[%s426_s2] ss:$0 sm:$0xff]  ;;  %v169_v51 = vld [vmem:[#allocation8 + $0x8] sm:$0xff]  ;;  %v168_v52 = vld [vmem:[#allocation8] sm:$0xff]  ;;  %s367_s2 = smov [#allocation10]  }
  0x24   :  { %114 = vmatpush.msra.mxu0 %v93_v14  ;;  %v232_v53 = vld [vmem:[%s428_s4] ss:$0 sm:$0xff]  ;;  %s210_s19 = sshll.u32 %s367_s2, 4  ;;  %s211_s19 = int_to_ptr.vmem [resolvable:$true] %s210_s19 }
  0x25   :  { %155 = vmatpush.msra.mxu1 %v134_v19  ;;  %187 = vmatpush.msra.mxu2 %v180_v36 }
  0x26   :  { %115 = vmatpush.msra.mxu0 %v92_v16 }
  0x27   :  { %156 = vmatpush.msra.mxu1 %v133_v21  ;;  %188 = vmatpush.msra.mxu2 %v179_v37 }
  0x28   :  { %116 = vmatpush.msra.mxu0 %v91_v18 }
  0x29   :  { %157 = vmatpush.msra.mxu1 %v132_v23  ;;  %189 = vmatpush.msra.mxu2 %v178_v38 }
  0x2a   :  { %117 = vmatpush.msra.mxu0 %v90_v20 }
  0x2b   :  { %158 = vmatpush.msra.mxu1 %v131_v25  ;;  %190 = vmatpush.msra.mxu2 %v177_v39 }
  0x2c   :  { %118 = vmatpush.msra.mxu0 %v89_v22 }
  0x2d   :  { %159 = vmatpush.msra.mxu1 %v130_v27  ;;  %191 = vmatpush.msra.mxu2 %v176_v40 }
  0x2e   :  { %119 = vmatpush.msra.mxu0 %v88_v24 }
  0x2f   :  { %160 = vmatpush.msra.mxu1 %v129_v30  ;;  %192 = vmatpush.msra.mxu2 %v175_v41 }
  0x30   :  { %120 = vmatpush.msra.mxu0 %v87_v26 }
  0x31   :  { %161 = vmatpush.msra.mxu1 %v128_v31  ;;  %193 = vmatpush.msra.mxu2 %v174_v42 }
  0x32   :  { %121 = vmatpush.msra.mxu0 %v86_v28 }
  0x33   :  { %122 = vmatmul.f32.vlgmr.msra.gmra.mxu0 %v85_v29  ;;  %162 = vmatpush.msra.mxu1 %v127_v32 }
  0x34   :  { %194 = vmatpush.msra.mxu2 %v173_v43 }
  0x36   :  { %195 = vmatpush.msra.mxu2 %v172_v44 }
  0x38   :  { %196 = vmatpush.msra.mxu2 %v171_v45 }
  0x3a   :  { %197 = vmatpush.msra.mxu2 %v170_v50 }
  0x3c   :  { %198 = vmatpush.msra.mxu2 %v169_v51 }
  0x3e   :  { %199 = vmatpush.msra.mxu2 %v168_v52 }
  0xb0   :  { %v123_v47 = vpop.f32.mrf.mxu0 }
  0xb1   :  { %v124_v48 = vadd.f32 %v231_v46, %v123_v47 }
  0xb3   :  { %v126_v49 = vmax.f32 %v124_v48, 0.0 }
  0xb5   :  { %163 = vmatmul.f32.vlgmr.msra.gmra.mxu1 %v126_v49 }
 0x132   :  { %v164_v54 = vpop.f32.mrf.mxu1 }
 0x133   :  { %v165_v55 = vadd.f32 %v232_v53, %v164_v54 }
 0x135   :  { %v167_v56 = vmax.f32 %v165_v55, 0.0 }
 0x137   :  { %200 = vmatmul.f32.vlgmr.msra.gmra.mxu2 %v167_v56 }
 0x1ba   :  { %v201_v57 = vpop.f32.mrf.mxu2 }
 0x1bb   :  { %204 = vst [vmem:[#allocation10] sm:$0xff] %v201_v57 }
 0x1bc   :  { %215 = dma.vmem_to_hbm [thread:$0]  %s211_s19, 128, %s213_s22, [#allocation4]  }
 0x1bd   :  { %359 = dma.done.wait [#allocation4], 128  }
 0x1be   :  { %360 = vsyncadd [#allocation4], 4294967168 }
 0x1bf   :  { %220 = vsyncpa [#allocation3], 1 }
 0x1c0   :  { %221 = vsyncpa [#allocation6], 1 }
 0x1c1   :  { %222 = vsyncpa [#allocation9], 1 }
 0x1c2   :  { %223 = vsyncpa [#allocation4], 1 }

</bundles_post_ra>
